<compile_context>
chip_gen: v7x
topology: tpu7x:2x2x1
jax: 0.10.0
libtpu: 0.0.40
codegen_flags: <defaults>
</compile_context>

<pallas_src>
import functools

import jax
import jax.numpy as jnp
from jax.experimental import pallas as pl
from jax.experimental.pallas import tpu as pltpu

# --- network hyperparameters (synthetic tcnn FullyFusedMLP config) ----------
N_INPUT_DIMS = 32           # n_input_dims()
N_OUTPUT_DIMS = 4           # n_output_dims()
WIDTH = 64                  # hidden width
N_OUTPUT_PADDED = 16        # tcnn pads output dims to a multiple of 16
BATCH_GRANULARITY = 128     # pyngp_bindings.batch_size_granularity()
MAX_BATCH_TILE = 2048       # largest batch tile per grid step (multiple of 128)
PARAM_DTYPE = jnp.bfloat16  # stand-in for tcnn fp16 param precision
LOSS_SCALE = 128.0          # fp16 precision path (forward-pass no-op)


def _mlp_kernel(x_ref, w0_ref, w1_ref, w2_ref, o_ref):
    """Fused no-bias MLP: relu(relu(x@W0)@W1)@W2 for one batch tile."""
    x = x_ref[...]  # already bf16 (cast fused into the jitted wrapper)
    h = jnp.dot(x, w0_ref[...], preferred_element_type=jnp.float32)
    h = jnp.maximum(h, 0.0).astype(PARAM_DTYPE)
    h = jnp.dot(h, w1_ref[...], preferred_element_type=jnp.float32)
    h = jnp.maximum(h, 0.0).astype(PARAM_DTYPE)
    out = jnp.dot(h, w2_ref[...], preferred_element_type=jnp.float32)
    o_ref[...] = out.astype(o_ref.dtype)


def _choose_batch_tile(padded_batch):
    """Pick a big tile (amortize per-step overhead) but keep >=2 grid steps
    when the batch allows it, so v7x's two TensorCores both get work."""
    tile = min(MAX_BATCH_TILE, padded_batch)
    if padded_batch >= 2 * BATCH_GRANULARITY:
        half = (padded_batch // 2) // BATCH_GRANULARITY * BATCH_GRANULARITY
        tile = min(tile, max(half, BATCH_GRANULARITY))
    return max(tile, BATCH_GRANULARITY)


def _fused_mlp(x_padded, w0, w1, w2, tile):
    padded_batch = x_padded.shape[0]
    grid = (padded_batch // tile,)
    return pl.pallas_call(
        _mlp_kernel,
        out_shape=jax.ShapeDtypeStruct((padded_batch, N_OUTPUT_PADDED),
                                       PARAM_DTYPE),
        grid_spec=pltpu.PrefetchScalarGridSpec(
            num_scalar_prefetch=0,
            grid=grid,
            in_specs=[
                pl.BlockSpec((tile, N_INPUT_DIMS), lambda i: (i, 0)),
                pl.BlockSpec((N_INPUT_DIMS, WIDTH), lambda i: (0, 0)),
                pl.BlockSpec((WIDTH, WIDTH), lambda i: (0, 0)),
                pl.BlockSpec((WIDTH, N_OUTPUT_PADDED), lambda i: (0, 0)),
            ],
            out_specs=pl.BlockSpec((tile, N_OUTPUT_PADDED), lambda i: (i, 0)),
        ),
        compiler_params=pltpu.CompilerParams(
            dimension_semantics=("parallel",)),
    )(x_padded, w0, w1, w2)
    # TODO(synk): if the store path ever saturates, fold 8 batch rows into the
    # lane axis for a lane-dense (padded/8, 128) output slab.


@functools.partial(jax.jit, static_argnames=("tile", "pad_rows"))
def _forward_impl(x, w0, w1, w2, *, tile, pad_rows):
    """Single fused forward: cast -> pad -> fused MLP -> slice."""
    batch = x.shape[0]
    xb = x.astype(PARAM_DTYPE)          # cast first so the pad moves half the bytes
    if pad_rows:
        xb = jnp.pad(xb, ((0, pad_rows), (0, 0)))
    out = _fused_mlp(xb, w0, w1, w2, tile)
    return out[:batch, :N_OUTPUT_DIMS]


class PallasTCNNModule:
    """JAX/Pallas analog of the PyTorch `Module` (forward pass only)."""

    def __init__(self, seed=1337):
        self.seed = seed
        self.dtype = PARAM_DTYPE
        # loss_scale is autograd-only machinery; kept for API parity.
        self.loss_scale = LOSS_SCALE
        # Deterministic "initial_params": one flat parameter vector, exactly
        # how tcnn hands params back to torch.
        n_params = (N_INPUT_DIMS * WIDTH + WIDTH * WIDTH
                    + WIDTH * N_OUTPUT_PADDED)
        key = jax.random.PRNGKey(seed)
        flat = jax.random.uniform(key, (n_params,), jnp.float32,
                                  minval=-0.1, maxval=0.1)
        self.params = flat  # flat fp32 parameter vector (like nn.Parameter)
        # Cache bf16 (param-precision) weight matrices once; avoids per-call
        # eager astype/reshape dispatches.
        self._w0, self._w1, self._w2 = self._unpack_params(flat)

    @staticmethod
    def _unpack_params(flat):
        # Row-major (in_features, out_features) packing of the flat vector.
        # TODO(synk): real tcnn checkpoints use a different native param
        # layout and would need a reorder here.
        p = flat.astype(PARAM_DTYPE)
        o0 = N_INPUT_DIMS * WIDTH
        o1 = o0 + WIDTH * WIDTH
        w0 = p[:o0].reshape(N_INPUT_DIMS, WIDTH)
        w1 = p[o0:o1].reshape(WIDTH, WIDTH)
        w2 = p[o1:].reshape(WIDTH, N_OUTPUT_PADDED)
        return (jax.device_put(w0), jax.device_put(w1), jax.device_put(w2))

    @property
    def n_input_dims(self):
        return N_INPUT_DIMS

    @property
    def n_output_dims(self):
        return N_OUTPUT_DIMS

    def __call__(self, x):
        # x: (batch, n_input_dims); mirrors Module.forward.
        batch_size = x.shape[0]
        # tcnn batch-granularity padding ...
        padded = (-(-batch_size // BATCH_GRANULARITY)) * BATCH_GRANULARITY
        tile = _choose_batch_tile(padded)
        # ... then round up to a multiple of the chosen tile (extra rows are
        # zero and sliced off below, so semantics are unchanged).
        padded = (-(-padded // tile)) * tile
        return _forward_impl(x, self._w0, self._w1, self._w2,
                             tile=tile, pad_rows=padded - batch_size)
        # TODO(synk): backward (bwd / bwd_bwd_input, loss_scale handling) is
        # autograd-only machinery and is not part of the forward kernel.


if __name__ == "__main__":
    module = PallasTCNNModule(seed=1337)

    key = jax.random.PRNGKey(0)
    batch = 200  # not a multiple of 128 -> exercises the batch-padding path
    x = jax.random.normal(key, (batch, N_INPUT_DIMS), dtype=jnp.float32)

    out = module(x)
    out = jax.block_until_ready(out)
    assert out.shape == (batch, N_OUTPUT_DIMS), out.shape
    assert bool(jnp.all(jnp.isfinite(out.astype(jnp.float32))))
    print("KERNEL_OK")
</pallas_src>

<mosaic_0001>
module attributes {stable_mosaic.version = 11 : i64} {
  func.func @_mlp_kernel(%arg0: i32, %arg1: memref<128x32xbf16, #tpu.memory_space<vmem>>, %arg2: memref<32x64xbf16, #tpu.memory_space<vmem>>, %arg3: memref<64x64xbf16, #tpu.memory_space<vmem>>, %arg4: memref<64x16xbf16, #tpu.memory_space<vmem>>, %arg5: memref<128x16xbf16, #tpu.memory_space<vmem>>) attributes {dimension_semantics = [#tpu.dimension_semantics<parallel>], iteration_bounds = array<i64: 2>, scalar_prefetch = 0 : i64, scratch_operands = 0 : i64, tpu.core_type = #tpu.core_type<tc>, window_params = [{transform_indices = @transform_0, window_bounds = array<i64: 128, 32>}, {pipeline_mode = #tpu.pipeline_mode<synchronous>, transform_indices = @transform_1, window_bounds = array<i64: 32, 64>}, {pipeline_mode = #tpu.pipeline_mode<synchronous>, transform_indices = @transform_2, window_bounds = array<i64: 64, 64>}, {pipeline_mode = #tpu.pipeline_mode<synchronous>, transform_indices = @transform_3, window_bounds = array<i64: 64, 16>}, {transform_indices = @transform_4, window_bounds = array<i64: 128, 16>}]} {
    %c0 = arith.constant 0 : index
    %c0_0 = arith.constant 0 : index
    %0 = vector.load %arg1[%c0, %c0_0] : memref<128x32xbf16, #tpu.memory_space<vmem>>, vector<128x32xbf16>
    %c0_1 = arith.constant 0 : index
    %c0_2 = arith.constant 0 : index
    %1 = vector.load %arg2[%c0_1, %c0_2] : memref<32x64xbf16, #tpu.memory_space<vmem>>, vector<32x64xbf16>
    %cst = arith.constant dense<0.000000e+00> : vector<128x64xf32>
    %2 = tpu.matmul %0, %1, %cst {dimension_numbers = #tpu.dot_dimension_numbers<[1], [0], [0], [1], [0, 0, 1, 1], [], []>} : vector<128x32xbf16>, vector<32x64xbf16>, vector<128x64xf32> -> vector<128x64xf32>
    %cst_3 = arith.constant 0.000000e+00 : f32
    %3 = vector.broadcast %cst_3 : f32 to vector<128x64xf32>
    %4 = arith.maximumf %2, %3 : vector<128x64xf32>
    %5 = arith.truncf %4 : vector<128x64xf32> to vector<128x64xbf16>
    %c0_4 = arith.constant 0 : index
    %c0_5 = arith.constant 0 : index
    %6 = vector.load %arg3[%c0_4, %c0_5] : memref<64x64xbf16, #tpu.memory_space<vmem>>, vector<64x64xbf16>
    %cst_6 = arith.constant dense<0.000000e+00> : vector<128x64xf32>
    %7 = tpu.matmul %5, %6, %cst_6 {dimension_numbers = #tpu.dot_dimension_numbers<[1], [0], [0], [1], [0, 0, 1, 1], [], []>} : vector<128x64xbf16>, vector<64x64xbf16>, vector<128x64xf32> -> vector<128x64xf32>
    %cst_7 = arith.constant 0.000000e+00 : f32
    %8 = vector.broadcast %cst_7 : f32 to vector<128x64xf32>
    %9 = arith.maximumf %7, %8 : vector<128x64xf32>
    %10 = arith.truncf %9 : vector<128x64xf32> to vector<128x64xbf16>
    %c0_8 = arith.constant 0 : index
    %c0_9 = arith.constant 0 : index
    %11 = vector.load %arg4[%c0_8, %c0_9] : memref<64x16xbf16, #tpu.memory_space<vmem>>, vector<64x16xbf16>
    %cst_10 = arith.constant dense<0.000000e+00> : vector<128x16xf32>
    %12 = tpu.matmul %10, %11, %cst_10 {dimension_numbers = #tpu.dot_dimension_numbers<[1], [0], [0], [1], [0, 0, 1, 1], [], []>} : vector<128x64xbf16>, vector<64x16xbf16>, vector<128x16xf32> -> vector<128x16xf32>
    %13 = arith.truncf %12 : vector<128x16xf32> to vector<128x16xbf16>
    %c0_11 = arith.constant 0 : index
    %c0_12 = arith.constant 0 : index
    %14 = vector.load %arg5[%c0_11, %c0_12] : memref<128x16xbf16, #tpu.memory_space<vmem>>, vector<128x16xbf16>
    tpu.vector_store %arg5[%c0_11, %c0_12], %13 {strides = array<i32>} : memref<128x16xbf16, #tpu.memory_space<vmem>>, vector<128x16xbf16>,
    return
  }
  func.func @transform_0(%arg0: i32) -> (i32, i32) {
    %c0_i32 = arith.constant 0 : i32
    %c0_i32_0 = arith.constant 0 : i32
    return %arg0, %c0_i32 : i32, i32
  }
  func.func @transform_1(%arg0: i32) -> (i32, i32) {
    %c0_i32 = arith.constant 0 : i32
    %c0_i32_0 = arith.constant 0 : i32
    %c0_i32_1 = arith.constant 0 : i32
    return %c0_i32, %c0_i32_0 : i32, i32
  }
  func.func @transform_2(%arg0: i32) -> (i32, i32) {
    %c0_i32 = arith.constant 0 : i32
    %c0_i32_0 = arith.constant 0 : i32
    %c0_i32_1 = arith.constant 0 : i32
    return %c0_i32, %c0_i32_0 : i32, i32
  }
  func.func @transform_3(%arg0: i32) -> (i32, i32) {
    %c0_i32 = arith.constant 0 : i32
    %c0_i32_0 = arith.constant 0 : i32
    %c0_i32_1 = arith.constant 0 : i32
    return %c0_i32, %c0_i32_0 : i32, i32
  }
  func.func @transform_4(%arg0: i32) -> (i32, i32) {
    %c0_i32 = arith.constant 0 : i32
    %c0_i32_0 = arith.constant 0 : i32
    return %arg0, %c0_i32 : i32, i32
  }
}

</mosaic_0001>

<bundles_post_ra>
// kernel: _forward_impl.1
= control target key start
LH: loop header
LB: loop body
LE: loop exit
PB: predicated region body
PF: predicated region fallthrough
CT: control target
= control target key end

     0   :  { %s1138_s15 = smov 0   ;;  %s1250_s0 = inlined_call_operand.vmem [shape: bf16[256,32], index: 0, kind: input, shape index: {}]   ;;  %s1251_s1 = inlined_call_operand.vmem [shape: bf16[32,64], index: 1, kind: input, shape index: {}]   ;;  %s1252_s2 = inlined_call_operand.vmem [shape: bf16[64,64], index: 2, kind: input, shape index: {}]   ;;  %s1253_s3 = inlined_call_operand.vmem [shape: bf16[64,16], index: 3, kind: input, shape index: {}]   ;;  %s1254_s4 = inlined_call_operand.vmem [shape: bf16[256,16], index: 4, kind: output, shape index: {}]  }
   0x1 LB: > { %s888_s16 = sadd.s32 4294967295, %s1111_s15   ;;  %p892_p0 = scmp.ge.s32.totalorder %s1111_s15, 1  ;;  %s1111_s15 = sphi %s1138_s15, %s14_s15  }
   0x2   : > { %p163_p1 = scmp.lt.s32.totalorder %s1111_s15, 3 }
   0x4   : > { %p164_p2 = pnand %p892_p0, %p163_p1 }
   0x5   : > { %v1087_v0 = vld [vmem:[%s1251_s1] sm:$0xff] (!%p164_p2)   ;;  %s893_s19 = sshll.u32 (!%p164_p2), %s888_s16, 4  ;;  %v1088_v1 = vld [vmem:[%s1251_s1 + $0x8] sm:$0xff] (!%p164_p2)   ;;  %vm274_vm0 = vcmask (!%p164_p2), 261120   ;;  %v1099_v12 = vld [vmem:[%s1252_s2 + $0x10] sm:$0xff] (!%p164_p2)   ;;  %vm452_vm1 = vcmask (!%p164_p2), 523264  }
   0x6   : > { %167 = sbr.rel (%p164_p2) target bundleno = 700 (0x2bc), region = 36  ;;  %p190_p3 = scmp.lt.s32.totalorder (!%p164_p2), %s893_s19, 31  ;;  %1007 = vmatprep.subr.bf16.mxu0 (!%p164_p2), %v1087_v0  ;;  %1075 = vmatprep.subr.bf16.mxu1 (!%p164_p2), %v1087_v0  ;;  %v1097_v2 = vld [vmem:[%s1252_s2] sm:$0xff] (!%p164_p2)   ;;  %v1098_v6 = vld [vmem:[%s1252_s2 + $0x8] sm:$0xff] (!%p164_p2)   ;;  %v1100_v13 = vld [vmem:[%s1252_s2 + $0x18] sm:$0xff] (!%p164_p2)   ;;  %vm815_vm2 = vcmask (!%p164_p2), 125952  }
   0x7   : > { %1008 = vmatpush3.bf16.msra.mxu0 (!%p164_p2), %v1087_v0  ;;  %1077 = vmatpush3.bf16.msra.mxu1 (!%p164_p2), %v1087_v0  ;;  %v1101_v14 = vld [vmem:[%s1253_s3] sm:$0xff] (!%p164_p2)   ;;  %v1102_v15 = vld [vmem:[%s1253_s3 + $0x8] sm:$0xff] (!%p164_p2)   ;;  %v1103_v56 = vld [vmem:[%s1253_s3 + $0x10] sm:$0xff] (!%p164_p2)  }
   0x8   : > { %1009 = vmatprep.subr.bf16.mxu0 (!%p164_p2), %v1088_v1  ;;  %1076 = vmatprep.subr.bf16.mxu1 (!%p164_p2), %v1088_v1  ;;  %v1104_v57 = vld [vmem:[%s1253_s3 + $0x18] sm:$0xff] (!%p164_p2)  }
   0xb   : > { %1010 = vmatpush3.bf16.msra.mxu0 (!%p164_p2), %v1088_v1  ;;  %1078 = vmatpush3.bf16.msra.mxu1 (!%p164_p2), %v1088_v1 }
   0xc   : > { %1027 = vmatprep.subr.bf16.mxu1 (!%p164_p2), %v1097_v2  ;;  %1051 = vmatprep.subr.bf16.mxu0 (!%p164_p2), %v1101_v14 }
   0xd   : > { %s1256_s19 = smov (!%p190_p3, %s893_s19), 31 }
   0xe   : > { %s894_s24 = sshll.u32 %s1256_s19, 2 }
   0xf   : > { %s193_s27 = scalar_lea.vmem %s1250_s0, %s894_s24  ;;  %s1213_s20 = scalar_lea.vmem %s1254_s4, %s894_s24 }
  0x10   : > { %v1089_v3 = vld [vmem:[%s193_s27] sm:$0xff]   ;;  %v1090_v4 = vld [vmem:[%s193_s27 + $0x8] sm:$0xff]   ;;  %v1091_v5 = vld [vmem:[%s193_s27 + $0x10] sm:$0xff]  }
  0x11   : > { %1011 = vmatprep.mubr.msk.bf16.mxu0 %vm274_vm0, %v1089_v3  ;;  %v1093_v7 = vld [vmem:[%s193_s27 + $0x20] sm:$0xff]   ;;  %v1094_v8 = vld [vmem:[%s193_s27 + $0x28] sm:$0xff]   ;;  %v1095_v9 = vld [vmem:[%s193_s27 + $0x30] sm:$0xff]  }
  0x12   : > { %1012 = vmatmul.mubr.msk.bf16.vlgmr.msra.gmra.mrb[0].mxu0 %vm274_vm0, %v1090_v4  ;;  %1019 = vmatprep.mubr.msk.bf16.mxu1 %vm274_vm0, %v1093_v7  ;;  %v1092_v10 = vld [vmem:[%s193_s27 + $0x18] sm:$0xff]  }
  0x13   : > { %1015 = vmatprep.mubr.msk.bf16.mxu0 %vm274_vm0, %v1091_v5  ;;  %1020 = vmatmul.mubr.msk.bf16.vlgmr.msra.gmra.mrb[0].mxu1 %vm274_vm0, %v1094_v8  ;;  %v1096_v11 = vld [vmem:[%s193_s27 + $0x38] sm:$0xff]  }
  0x14   : > { %1023 = vmatprep.mubr.msk.bf16.mxu1 %vm274_vm0, %v1095_v9  ;;  %1028 = vmatpush3.bf16.msra.mxu1 %v1097_v2 }
  0x15   : > { %1029 = vmatprep.subr.bf16.mxu1 %v1098_v6  ;;  %1052 = vmatpush3.bf16.msra.mxu0 %v1101_v14 }
  0x16   : > { %1053 = vmatprep.subr.bf16.mxu0 %v1102_v15 }
  0x18   : > { %1030 = vmatpush3.bf16.msra.mxu1 %v1098_v6 }
  0x19   : > { %1031 = vmatprep.subr.bf16.mxu1 %v1099_v12  ;;  %1054 = vmatpush3.bf16.msra.mxu0 %v1102_v15 }
  0x1a   : > { %1016 = vmatmul.mubr.msk.bf16.gmra.mrb[4].mxu0 %vm274_vm0, %v1092_v10  ;;  %1055 = vmatprep.subr.bf16.mxu0 %v1103_v56 }
  0x1b   : > { %1024 = vmatmul.mubr.msk.bf16.gmra.mrb[4].mxu1 %vm274_vm0, %v1096_v11 }
  0x1c   : > { %1032 = vmatpush3.bf16.msra.mxu1 %v1099_v12 }
  0x1d   : > { %1033 = vmatprep.subr.bf16.mxu1 %v1100_v13  ;;  %1056 = vmatpush3.bf16.msra.mxu0 %v1103_v56 }
  0x1e   : > { %1057 = vmatprep.subr.bf16.mxu0 %v1104_v57 }
  0x20   : > { %1034 = vmatpush3.bf16.msra.mxu1 %v1100_v13 }
  0x21   : > { %1058 = vmatpush3.bf16.msra.mxu0 %v1104_v57 }
  0xe5   : > { %v1013_v16 = vpop.f32.mrb[0].mxu0 }
  0xe6   : > { %v333_v17 = vpop.f32.mrb[1].mxu0  ;;  %v398_v19 = vmax.f32 %v1013_v16, 0.0  ;;  %v1021_v24 = vpop.f32.mrb[0].mxu1 }
  0xe7   : > { %v1014_v18 = vpop.f32.mrb[2].mxu0  ;;  %v396_v22 = vmax.f32 %v333_v17, 0.0  ;;  %v406_v26 = vmax.f32 %v1021_v24, 0.0  ;;  %v365_v27 = vpop.f32.mrb[1].mxu1 }
  0xe8   : > { %v399_v20 = vmax.f32 %v1014_v18, 0.0  ;;  %v336_v21 = vpop.f32.mrb[3].mxu0  ;;  %v404_v29 = vmax.f32 %v365_v27, 0.0  ;;  %v1022_v30 = vpop.f32.mrb[2].mxu1 }
  0xe9   : > { %v397_v23 = vmax.f32 %v336_v21, 0.0  ;;  %v407_v31 = vmax.f32 %v1022_v30, 0.0  ;;  %v368_v32 = vpop.f32.mrb[3].mxu1 }
  0xea   : > { %v413_v25 = vpack.c.bf16 %v399_v20, %v398_v19  ;;  %v405_v34 = vmax.f32 %v368_v32, 0.0 }
  0xeb   : > { %v412_v28 = vpack.c.bf16 %v397_v23, %v396_v22  ;;  %v417_v36 = vpack.c.bf16 %v407_v31, %v406_v26 }
  0xec   : > { %v416_v38 = vpack.c.bf16 %v405_v34, %v404_v29 }
  0xed   : > { %v1017_v33 = vpop.f32.mrb[4].mxu0  ;;  %1035 = vmatprep.mubr.msk.bf16.mxu1 %vm452_vm1, %v412_v28 }
  0xee   : > { %v349_v35 = vpop.f32.mrb[5].mxu0  ;;  %1036 = vmatmul.mubr.msk.bf16.vlgmr.msra.gmra.mrb[8].mxu1 %vm452_vm1, %v413_v25  ;;  %v402_v39 = vmax.f32 %v1017_v33, 0.0  ;;  %v1025_v44 = vpop.f32.mrb[4].mxu1 }
  0xef   : > { %v1018_v37 = vpop.f32.mrb[6].mxu0  ;;  %v400_v42 = vmax.f32 %v349_v35, 0.0  ;;  %v410_v46 = vmax.f32 %v1025_v44, 0.0  ;;  %v381_v47 = vpop.f32.mrb[5].mxu1 }
  0xf0   : > { %v403_v40 = vmax.f32 %v1018_v37, 0.0  ;;  %v352_v41 = vpop.f32.mrb[7].mxu0  ;;  %v408_v49 = vmax.f32 %v381_v47, 0.0  ;;  %v1026_v50 = vpop.f32.mrb[6].mxu1 }
  0xf1   : > { %v401_v43 = vmax.f32 %v352_v41, 0.0  ;;  %v411_v51 = vmax.f32 %v1026_v50, 0.0  ;;  %v384_v52 = vpop.f32.mrb[7].mxu1 }
  0xf2   : > { %v415_v45 = vpack.c.bf16 %v403_v40, %v402_v39  ;;  %v409_v53 = vmax.f32 %v384_v52, 0.0 }
  0xf3   : > { %v414_v48 = vpack.c.bf16 %v401_v43, %v400_v42  ;;  %v419_v54 = vpack.c.bf16 %v411_v51, %v410_v46 }
  0xf4   : > { %v418_v55 = vpack.c.bf16 %v409_v53, %v408_v49 }
  0xf5   : > { %1039 = vmatprep.mubr.msk.bf16.mxu1 %vm452_vm1, %v414_v48 }
  0xf6   : > { %1040 = vmatmul.mubr.msk.bf16.gmra.mrb[12].mxu1 %vm452_vm1, %v415_v45 }
  0xf7   : > { %1043 = vmatprep.mubr.msk.bf16.mxu1 %vm452_vm1, %v416_v38 }
  0xfe   : > { %1044 = vmatmul.mubr.msk.bf16.gmra.mrb[16].mxu1 %vm452_vm1, %v417_v36 }
  0xff   : > { %1047 = vmatprep.mubr.msk.bf16.mxu1 %vm452_vm1, %v418_v55 }
 0x106   : > { %1048 = vmatmul.mubr.msk.bf16.gmra.mrb[20].mxu1 %vm452_vm1, %v419_v54 }
 0x1c1   : > { %v1037_v58 = vpop.f32.mrb[8].mxu1 }
 0x1c2   : > { %v511_v59 = vpop.f32.mrb[9].mxu1  ;;  %v576_v61 = vmax.f32 %v1037_v58, 0.0 }
 0x1c3   : > { %v1038_v60 = vpop.f32.mrb[10].mxu1  ;;  %v574_v0 = vmax.f32 %v511_v59, 0.0 }
 0x1c4   : > { %v577_v62 = vmax.f32 %v1038_v60, 0.0  ;;  %v514_v63 = vpop.f32.mrb[11].mxu1 }
 0x1c5   : > { %v575_v1 = vmax.f32 %v514_v63, 0.0 }
 0x1c6   : > { %v591_v2 = vpack.c.bf16 %v577_v62, %v576_v61 }
 0x1c7   : > { %v590_v3 = vpack.c.bf16 %v575_v1, %v574_v0 }
 0x1c9   : > { %v1041_v4 = vpop.f32.mrb[12].mxu1  ;;  %1059 = vmatprep.mubr.msk.bf16.mxu0 %vm452_vm1, %v590_v3 }
 0x1ca   : > { %v527_v5 = vpop.f32.mrb[13].mxu1  ;;  %1060 = vmatmul.mubr.msk.bf16.vlgmr.msra.gmra.mrb[8].mxu0 %vm452_vm1, %v591_v2  ;;  %v580_v7 = vmax.f32 %v1041_v4, 0.0 }
 0x1cb   : > { %v1042_v6 = vpop.f32.mrb[14].mxu1  ;;  %v578_v10 = vmax.f32 %v527_v5, 0.0 }
 0x1cc   : > { %v581_v8 = vmax.f32 %v1042_v6, 0.0  ;;  %v530_v9 = vpop.f32.mrb[15].mxu1 }
 0x1cd   : > { %v579_v11 = vmax.f32 %v530_v9, 0.0 }
 0x1ce   : > { %v593_v12 = vpack.c.bf16 %v581_v8, %v580_v7 }
 0x1cf   : > { %v592_v13 = vpack.c.bf16 %v579_v11, %v578_v10 }
 0x1d1   : > { %v1045_v14 = vpop.f32.mrb[16].mxu1  ;;  %1063 = vmatprep.mubr.msk.bf16.mxu0 %vm452_vm1, %v592_v13 }
 0x1d2   : > { %v543_v15 = vpop.f32.mrb[17].mxu1  ;;  %1064 = vmatmul.mubr.msk.bf16.gmra.mrb[12].mxu0 %vm452_vm1, %v593_v12  ;;  %v584_v17 = vmax.f32 %v1045_v14, 0.0 }
 0x1d3   : > { %v1046_v16 = vpop.f32.mrb[18].mxu1  ;;  %v582_v20 = vmax.f32 %v543_v15, 0.0 }
 0x1d4   : > { %v585_v18 = vmax.f32 %v1046_v16, 0.0  ;;  %v546_v19 = vpop.f32.mrb[19].mxu1 }
 0x1d5   : > { %v583_v21 = vmax.f32 %v546_v19, 0.0 }
 0x1d6   : > { %v595_v22 = vpack.c.bf16 %v585_v18, %v584_v17 }
 0x1d7   : > { %v594_v23 = vpack.c.bf16 %v583_v21, %v582_v20 }
 0x1d9   : > { %v1049_v24 = vpop.f32.mrb[20].mxu1  ;;  %1067 = vmatprep.mubr.msk.bf16.mxu0 %vm452_vm1, %v594_v23 }
 0x1da   : > { %v559_v25 = vpop.f32.mrb[21].mxu1  ;;  %1068 = vmatmul.mubr.msk.bf16.gmra.mrb[16].mxu0 %vm452_vm1, %v595_v22  ;;  %v588_v27 = vmax.f32 %v1049_v24, 0.0 }
 0x1db   : > { %v1050_v26 = vpop.f32.mrb[22].mxu1  ;;  %v586_v30 = vmax.f32 %v559_v25, 0.0 }
 0x1dc   : > { %v589_v28 = vmax.f32 %v1050_v26, 0.0  ;;  %v562_v29 = vpop.f32.mrb[23].mxu1 }
 0x1dd   : > { %v587_v31 = vmax.f32 %v562_v29, 0.0 }
 0x1de   : > { %v597_v32 = vpack.c.bf16 %v589_v28, %v588_v27 }
 0x1df   : > { %v596_v33 = vpack.c.bf16 %v587_v31, %v586_v30 }
 0x1e1   : > { %1071 = vmatprep.mubr.msk.bf16.mxu0 %vm452_vm1, %v596_v33 }
 0x1e2   : > { %1072 = vmatmul.mubr.msk.bf16.gmra.mrb[20].mxu0 %vm452_vm1, %v597_v32 }
 0x29d   : > { %v1061_v34 = vpop.f32.mrb[8].mxu0 }
 0x29e   : > { %v959_v35 = vpack.c.bf16 %v1061_v34, %v1061_v34  ;;  %v688_v36 = vpop.f32.mrb[9].mxu0 }
 0x29f   : > { %v957_v37 = vpack.c.bf16 %v688_v36, %v688_v36  ;;  %v1062_v38 = vpop.f32.mrb[10].mxu0 }
 0x2a0   : > { %818 = vst.msk [vmem:[%s1213_s20 + $0x8] sm:$0xf] %vm815_vm2, %v959_v35  ;;  %v960_v39 = vpack.c.bf16 %v1062_v38, %v1062_v38  ;;  %v691_v40 = vpop.f32.mrb[11].mxu0 }
 0x2a1   : > { %816 = vst.msk [vmem:[%s1213_s20] sm:$0xf] %vm815_vm2, %v957_v37  ;;  %v958_v41 = vpack.c.bf16 %v691_v40, %v691_v40 }
 0x2a2   : > { %819 = vst.msk [vmem:[%s1213_s20 + $0xc] sm:$0xf] %vm815_vm2, %v960_v39 }
 0x2a3   : > { %817 = vst.msk [vmem:[%s1213_s20 + $0x4] sm:$0xf] %vm815_vm2, %v958_v41 }
 0x2a5   : > { %v1065_v42 = vpop.f32.mrb[12].mxu0 }
 0x2a6   : > { %v963_v43 = vpack.c.bf16 %v1065_v42, %v1065_v42  ;;  %v704_v44 = vpop.f32.mrb[13].mxu0 }
 0x2a7   : > { %v961_v45 = vpack.c.bf16 %v704_v44, %v704_v44  ;;  %v1066_v46 = vpop.f32.mrb[14].mxu0 }
 0x2a8   : > { %822 = vst.msk [vmem:[%s1213_s20 + $0x18] sm:$0xf] %vm815_vm2, %v963_v43  ;;  %v964_v47 = vpack.c.bf16 %v1066_v46, %v1066_v46  ;;  %v707_v48 = vpop.f32.mrb[15].mxu0 }
 0x2a9   : > { %820 = vst.msk [vmem:[%s1213_s20 + $0x10] sm:$0xf] %vm815_vm2, %v961_v45  ;;  %v962_v49 = vpack.c.bf16 %v707_v48, %v707_v48 }
 0x2aa   : > { %823 = vst.msk [vmem:[%s1213_s20 + $0x1c] sm:$0xf] %vm815_vm2, %v964_v47 }
 0x2ab   : > { %821 = vst.msk [vmem:[%s1213_s20 + $0x14] sm:$0xf] %vm815_vm2, %v962_v49 }
 0x2ad   : > { %v1069_v50 = vpop.f32.mrb[16].mxu0 }
 0x2ae   : > { %v967_v51 = vpack.c.bf16 %v1069_v50, %v1069_v50  ;;  %v720_v52 = vpop.f32.mrb[17].mxu0 }
 0x2af   : > { %v965_v53 = vpack.c.bf16 %v720_v52, %v720_v52  ;;  %v1070_v54 = vpop.f32.mrb[18].mxu0 }
 0x2b0   : > { %826 = vst.msk [vmem:[%s1213_s20 + $0x28] sm:$0xf] %vm815_vm2, %v967_v51  ;;  %v968_v55 = vpack.c.bf16 %v1070_v54, %v1070_v54  ;;  %v723_v56 = vpop.f32.mrb[19].mxu0 }
 0x2b1   : > { %824 = vst.msk [vmem:[%s1213_s20 + $0x20] sm:$0xf] %vm815_vm2, %v965_v53  ;;  %v966_v57 = vpack.c.bf16 %v723_v56, %v723_v56 }
 0x2b2   : > { %827 = vst.msk [vmem:[%s1213_s20 + $0x2c] sm:$0xf] %vm815_vm2, %v968_v55 }
 0x2b3   : > { %825 = vst.msk [vmem:[%s1213_s20 + $0x24] sm:$0xf] %vm815_vm2, %v966_v57 }
 0x2b5   : > { %v1073_v58 = vpop.f32.mrb[20].mxu0 }
 0x2b6   : > { %v971_v59 = vpack.c.bf16 %v1073_v58, %v1073_v58  ;;  %v736_v60 = vpop.f32.mrb[21].mxu0 }
 0x2b7   : > { %v969_v61 = vpack.c.bf16 %v736_v60, %v736_v60  ;;  %v1074_v62 = vpop.f32.mrb[22].mxu0 }
 0x2b8   : > { %830 = vst.msk [vmem:[%s1213_s20 + $0x38] sm:$0xf] %vm815_vm2, %v971_v59  ;;  %v972_v63 = vpack.c.bf16 %v1074_v62, %v1074_v62  ;;  %v739_v0 = vpop.f32.mrb[23].mxu0 }
 0x2b9   : > { %828 = vst.msk [vmem:[%s1213_s20 + $0x30] sm:$0xf] %vm815_vm2, %v969_v61  ;;  %v970_v1 = vpack.c.bf16 %v739_v0, %v739_v0 }
 0x2ba   : > { %831 = vst.msk [vmem:[%s1213_s20 + $0x3c] sm:$0xf] %vm815_vm2, %v972_v63 }
 0x2bb   : > { %829 = vst.msk [vmem:[%s1213_s20 + $0x34] sm:$0xf] %vm815_vm2, %v970_v1 }
 0x2bc PF: > { %s14_s15 = sadd.s32 1, %s1111_s15  }
 0x2bd   : > { %p11_p4 = scmp.ge.s32.totalorder %s14_s15, 4  }
 0x2bf   :  { %13 = sbr.rel (!%p11_p4) target bundleno = 1 (0x1), region = 66 }

</bundles_post_ra>
